<compile_context>
chip_gen: v7x
topology: tpu7x:2x2x1
jax: 0.10.0
libtpu: 0.0.40
codegen_flags: <defaults>
</compile_context>

<pallas_src>
import jax
import jax.numpy as jnp
from jax.experimental import pallas as pl
from jax.experimental.pallas import tpu as pltpu


def _round_up(x, m):
    return ((x + m - 1) // m) * m


def lm_head_kernel(h_ref, w_ref, o_ref):
    # h_ref: (tm, K)  bf16 hidden-state tile
    # w_ref: (K, tn)  bf16 pre-transposed embedding-weight tile
    # o_ref: (tm, tn) logits tile; f32 accumulation on the MXU, cast on store.
    o_ref[...] = jnp.dot(
        h_ref[...], w_ref[...], preferred_element_type=jnp.float32
    ).astype(o_ref.dtype)


def prepare_lm_head_weight(emb_weight, *, tn=1024, compute_dtype=jnp.bfloat16):
    """One-time weight prep. Call at model init, NOT per forward pass.

    emb_weight: (vocab, n_embd) tied wte weight.
    Returns (w_t_padded, vocab, tn_eff):
      w_t_padded: (n_embd, V_pad) compute_dtype, transposed + zero-padded vocab.
    """
    vocab, n_embd = emb_weight.shape
    gv = pl.cdiv(vocab, tn)
    tn_eff = _round_up(pl.cdiv(vocab, gv), 128)   # lane-dense, minimal slop
    v_pad = gv * tn_eff
    w_t = emb_weight.astype(compute_dtype).T       # (n_embd, vocab)
    if v_pad != vocab:
        w_t = jnp.pad(w_t, ((0, 0), (0, v_pad - vocab)))
    return w_t, vocab, tn_eff


def gpt2_lm_head_prepared(hidden_state, prepared, *, tm=1024,
                          compute_dtype=jnp.bfloat16, out_dtype=None):
    """hidden_state: (batch, seq, n_embd); prepared: output of prepare_lm_head_weight."""
    w_t, vocab, tn_eff = prepared
    batch, seq, n_embd = hidden_state.shape
    k, v_pad = w_t.shape
    assert k == n_embd
    if out_dtype is None:
        out_dtype = hidden_state.dtype   # PyTorch semantics: logits in hidden dtype

    M = batch * seq

    # Adaptive M tiling: keep the padded fraction small while staying (8,·) aligned.
    gm = pl.cdiv(M, tm)
    tm_eff = max(8, _round_up(pl.cdiv(M, gm), 8))
    m_pad = gm * tm_eff
    gv = v_pad // tn_eff

    h2d = hidden_state.reshape(M, n_embd).astype(compute_dtype)
    if m_pad != M:
        h2d = jnp.pad(h2d, ((0, m_pad - M), (0, 0)))

    in_bytes = jnp.dtype(compute_dtype).itemsize
    out_bytes = jnp.dtype(out_dtype).itemsize
    hidden_bytes = m_pad * n_embd * in_bytes
    weight_bytes = n_embd * v_pad * in_bytes

    # Operand residency:
    #   A (hidden resident, vocab innermost): weight re-streamed gm times.
    #   B (weight resident, M innermost):     hidden re-streamed gv times.
    # Pick the cheaper; for decode (gm == 1) prefer B so the vocab axis is the
    # leading parallel dim and the v7x 2-TC split hits a non-trivial axis.
    traffic_a = weight_bytes * gm + hidden_bytes
    traffic_b = hidden_bytes * gv + weight_bytes
    weight_resident = (gm == 1) or (traffic_b < traffic_a)

    if weight_resident:
        grid = (gv, gm)
        h_spec = pl.BlockSpec((tm_eff, n_embd), lambda a, b: (b, 0))
        w_spec = pl.BlockSpec((n_embd, tn_eff), lambda a, b: (0, a))
        o_spec = pl.BlockSpec((tm_eff, tn_eff), lambda a, b: (b, a))
        streamed_bytes = traffic_b
    else:
        grid = (gm, gv)
        h_spec = pl.BlockSpec((tm_eff, n_embd), lambda i, j: (i, 0))
        w_spec = pl.BlockSpec((n_embd, tn_eff), lambda i, j: (0, j))
        o_spec = pl.BlockSpec((tm_eff, tn_eff), lambda i, j: (i, j))
        streamed_bytes = traffic_a

    # VMEM budget: double-buffered input tiles + output tile, capped at physical
    # VMEM (64 MiB on v7x) with a little headroom over the 32 MiB scoped default.
    tile_bytes = 2 * (tm_eff * n_embd * in_bytes
                      + n_embd * tn_eff * in_bytes
                      + tm_eff * tn_eff * out_bytes)
    try:
        phys_vmem = int(pltpu.get_tpu_info().vmem_capacity_bytes)
    except Exception:
        phys_vmem = 64 * 1024 * 1024
    vmem_limit = int(min(phys_vmem,
                         max(32 * 1024 * 1024, tile_bytes + (4 << 20))))

    cost = pl.CostEstimate(
        flops=2 * m_pad * n_embd * v_pad,
        transcendentals=0,
        bytes_accessed=streamed_bytes + m_pad * v_pad * out_bytes,
    )

    out = pl.pallas_call(
        lm_head_kernel,
        out_shape=jax.ShapeDtypeStruct((m_pad, v_pad), out_dtype),
        grid_spec=pltpu.PrefetchScalarGridSpec(
            num_scalar_prefetch=0,
            grid=grid,
            in_specs=[h_spec, w_spec],
            out_specs=o_spec,
        ),
        compiler_params=pltpu.CompilerParams(
            dimension_semantics=("parallel", "parallel"),
            vmem_limit_bytes=vmem_limit,
        ),
        cost_estimate=cost,
    )(h2d, w_t)

    # Strip padding (only if any was added) and restore (batch, seq, vocab).
    if m_pad != M or v_pad != vocab:
        out = out[:M, :vocab]
    return out.reshape(batch, seq, vocab)


def gpt2_lm_head(hidden_state, emb_weight, *, tm=1024, tn=1024,
                 compute_dtype=jnp.bfloat16, out_dtype=None):
    """Convenience one-shot wrapper (prep + matmul). For repeated calls, use
    prepare_lm_head_weight() once and gpt2_lm_head_prepared() per step."""
    prepared = prepare_lm_head_weight(emb_weight, tn=tn, compute_dtype=compute_dtype)
    return gpt2_lm_head_prepared(hidden_state, prepared, tm=tm,
                                 compute_dtype=compute_dtype, out_dtype=out_dtype)


if __name__ == "__main__":
    # Small, forward-consistent shapes.
    batch, seq, n_embd, vocab = 2, 8, 32, 256

    key = jax.random.PRNGKey(0)
    k_h, k_w = jax.random.split(key)
    hidden_state = jax.random.normal(k_h, (batch, seq, n_embd), dtype=jnp.float32)
    # Deterministic synthetic "embedding" weights (tied wte in real GPT-2).
    emb_weight = jax.random.normal(k_w, (vocab, n_embd), dtype=jnp.float32) * 0.02

    # One-time weight prep (hoisted out of the hot path), then the kernel call.
    prepared = prepare_lm_head_weight(emb_weight)
    logits = gpt2_lm_head_prepared(hidden_state, prepared)
    jax.block_until_ready(logits)

    # Correctness check vs plain JAX reference (hidden @ W.T); tolerance reflects
    # the bf16 operand cast with f32 MXU accumulation.
    ref = hidden_state @ emb_weight.T
    assert logits.shape == (batch, seq, vocab)
    assert logits.dtype == hidden_state.dtype
    assert jnp.allclose(logits, ref, atol=1e-2, rtol=1e-2)

    # Also exercise the convenience wrapper + bf16-logits option once.
    logits_bf16 = gpt2_lm_head(hidden_state, emb_weight, out_dtype=jnp.bfloat16)
    jax.block_until_ready(logits_bf16)
    assert logits_bf16.dtype == jnp.bfloat16
    assert jnp.allclose(logits_bf16.astype(jnp.float32), ref, atol=5e-2, rtol=5e-2)

    print("KERNEL_OK")
</pallas_src>

<mosaic_0001>
module attributes {stable_mosaic.version = 11 : i64} {
  func.func @lm_head_kernel(%arg0: i32, %arg1: i32, %arg2: memref<16x32xbf16, #tpu.memory_space<vmem>>, %arg3: memref<32x256xbf16, #tpu.memory_space<vmem>>, %arg4: memref<16x256xf32, #tpu.memory_space<vmem>>) attributes {dimension_semantics = [#tpu.dimension_semantics<parallel>, #tpu.dimension_semantics<parallel>], iteration_bounds = array<i64: 1, 1>, scalar_prefetch = 0 : i64, scratch_operands = 0 : i64, tpu.core_type = #tpu.core_type<tc>, window_params = [{transform_indices = @transform_0, window_bounds = array<i64: 16, 32>}, {transform_indices = @transform_1, window_bounds = array<i64: 32, 256>}, {transform_indices = @transform_2, window_bounds = array<i64: 16, 256>}]} {
    %c0 = arith.constant 0 : index
    %c0_0 = arith.constant 0 : index
    %0 = vector.load %arg2[%c0, %c0_0] : memref<16x32xbf16, #tpu.memory_space<vmem>>, vector<16x32xbf16>
    %c0_1 = arith.constant 0 : index
    %c0_2 = arith.constant 0 : index
    %1 = vector.load %arg3[%c0_1, %c0_2] : memref<32x256xbf16, #tpu.memory_space<vmem>>, vector<32x256xbf16>
    %cst = arith.constant dense<0.000000e+00> : vector<16x256xf32>
    %2 = tpu.matmul %0, %1, %cst {dimension_numbers = #tpu.dot_dimension_numbers<[1], [0], [0], [1], [0, 0, 1, 1], [], []>} : vector<16x32xbf16>, vector<32x256xbf16>, vector<16x256xf32> -> vector<16x256xf32>
    %c0_3 = arith.constant 0 : index
    %c0_4 = arith.constant 0 : index
    %3 = vector.load %arg4[%c0_3, %c0_4] : memref<16x256xf32, #tpu.memory_space<vmem>>, vector<16x256xf32>
    tpu.vector_store %arg4[%c0_3, %c0_4], %2 {strides = array<i32>} : memref<16x256xf32, #tpu.memory_space<vmem>>, vector<16x256xf32>,
    return
  }
  func.func @transform_0(%arg0: i32, %arg1: i32) -> (i32, i32) {
    %c0_i32 = arith.constant 0 : i32
    %c0_i32_0 = arith.constant 0 : i32
    return %arg1, %c0_i32 : i32, i32
  }
  func.func @transform_1(%arg0: i32, %arg1: i32) -> (i32, i32) {
    %c0_i32 = arith.constant 0 : i32
    %c0_i32_0 = arith.constant 0 : i32
    return %c0_i32, %arg0 : i32, i32
  }
  func.func @transform_2(%arg0: i32, %arg1: i32) -> (i32, i32) {
    %c0_i32 = arith.constant 0 : i32
    return %arg1, %arg0 : i32, i32
  }
}

</mosaic_0001>

<bundles_post_ra>
// kernel: tpu_custom_call.1
= control target key start
LH: loop header
LB: loop body
LE: loop exit
PB: predicated region body
PF: predicated region fallthrough
CT: control target
= control target key end

     0   :  { %7 = vsyncpa [#allocation3], 0  ;;  %s297_s0 = inlined_call_operand.hbm [shape: bf16[16,32], index: 0, kind: input, shape index: {}]   ;;  %s298_s1 = inlined_call_operand.hbm [shape: bf16[32,256], index: 1, kind: input, shape index: {}]   ;;  %s299_s2 = inlined_call_operand.hbm [shape: f32[16,256], index: 2, kind: output, shape index: {}]  }
   0x1   :  { %8 = vsyncpa [#allocation6], 0 }
   0x2   :  { %9 = vsyncpa [#allocation4], 0  ;;  %s236_s9 = smov [#allocation2]   ;;  %s164_s13 = scalar_lea.hbm %s297_s0, 128 }
   0x3   :  { %s15_s10 = sshll.u32 %s236_s9, 4  ;;  %p165_p0 = scmp.ne.s32.totalorder %s297_s0, %s164_s13  ;;  %s16_s10 = int_to_ptr.vmem [resolvable:$true] %s15_s10 }
   0x4   :  { %p168_p1 = scmp.lt.u32.totalorder %s164_s13, %s297_s0 }
   0x6   :  { %p170_p2 = pnand %p168_p1, %p165_p0 }
   0x8   :  { %173 = shalt.err (!%p170_p2)
}
   0x9   :  { %s174_s18 = scalar_lea.vmem %s16_s10, 128  ;;  %p179_p4 = scmp.lt.s32.totalorder %s16_s10, %s16_s10 }
   0xa   :  { %p175_p3 = scmp.ne.s32.totalorder %s16_s10, %s174_s18  ;;  %p180_p5 = scmp.lt.s32.totalorder %s174_s18, %s174_s18 }
   0xc   :  { %p181_p6 = por %p180_p5, %p179_p4 }
   0xe   :  { %p182_p7 = pnand %p181_p6, %p175_p3 }
  0x10   :  { %185 = shalt.err (!%p182_p7)
}
  0x11   :  { %s237_s19 = smov 64   ;;  %s238_s20 = smov 4  }
  0x12   :  { %21 = dma.hbm_to_vmem [thread:$0]  %s297_s0, 128, %s16_s10, [#allocation3], %s237_s19, %s237_s19, %s238_s20  }
  0x13   :  { %s239_s23 = smov [#allocation5]   ;;  %s186_s27 = scalar_lea.hbm %s298_s1, 512 }
  0x14   :  { %s27_s24 = sshll.u32 %s239_s23, 4  ;;  %p187_p8 = scmp.ne.s32.totalorder %s298_s1, %s186_s27  ;;  %s28_s24 = int_to_ptr.vmem [resolvable:$true] %s27_s24 }
  0x15   :  { %p190_p9 = scmp.lt.u32.totalorder %s186_s27, %s298_s1 }
  0x17   :  { %p192_p10 = pnand %p190_p9, %p187_p8 }
  0x19   :  { %195 = shalt.err (!%p192_p10)
}
  0x1a   :  { %s196_s4 = scalar_lea.vmem %s28_s24, 512  ;;  %p201_p12 = scmp.lt.s32.totalorder %s28_s24, %s28_s24 }
  0x1b   :  { %p197_p11 = scmp.ne.s32.totalorder %s28_s24, %s196_s4  ;;  %p202_p13 = scmp.lt.s32.totalorder %s196_s4, %s196_s4 }
  0x1d   :  { %p203_p0 = por %p202_p13, %p201_p12 }
  0x1f   :  { %p204_p1 = pnand %p203_p0, %p197_p11 }
  0x21   :  { %207 = shalt.err (!%p204_p1)
}
  0x22   :  { %s240_s0 = smov 128   ;;  %s241_s5 = smov 8  }
  0x23   :  { %33 = dma.hbm_to_vmem [thread:$0]  %s298_s1, 512, %s28_s24, [#allocation6], %s240_s0, %s240_s0, %s241_s5  }
  0x24   :  { %230 = dma.done.wait [#allocation3], 128  }
  0x25   :  { %231 = vsyncadd [#allocation3], 4294967168 }
  0x26   :  { %232 = dma.done.wait [#allocation6], 512  }
  0x27   :  { %233 = vsyncadd [#allocation6], 4294966784  ;;  %v242_v0 = vmov 0   ;;  %v157_v1 = vld [vmem:[#allocation5 + $0x4] ss:$8 sps:$4 sm:$0xff]   ;;  %v163_v5 = vld [vmem:[#allocation2] sm:$0xff]  }
  0x28   :  { %108 = vmatprep.mubr.bf16.mxu0 %v242_v0  ;;  %v159_v2 = vld [vmem:[#allocation5] ss:$8 sps:$4 sm:$0xff]   ;;  %76 = vmatprep.subr.bf16.mxu0 %v157_v1  ;;  %v160_v3 = vld [vmem:[#allocation5 + $0x14] ss:$8 sps:$4 sm:$0xff]   ;;  %v162_v4 = vld [vmem:[#allocation5 + $0x10] ss:$8 sps:$4 sm:$0xff]  }
  0x29   :  { %77 = vmatpush1.bf16.msra.mxu0 %v159_v2  ;;  %vm72_vm0 = vcmask 261120   ;;  %s243_s8 = smov [#allocation7]  }
  0x2a   :  { %78 = vmatprep.subr.bf16.mxu0 %v160_v3  ;;  %s128_s9 = sshll.u32 %s243_s8, 4  ;;  %s129_s9 = int_to_ptr.vmem [resolvable:$true] %s128_s9 }
  0x2b   :  { %s208_s1 = scalar_lea.vmem %s129_s9, 512  ;;  %p213_p3 = scmp.lt.s32.totalorder %s129_s9, %s129_s9 }
  0x2c   :  { %p209_p2 = scmp.ne.s32.totalorder %s129_s9, %s208_s1  ;;  %p214_p4 = scmp.lt.s32.totalorder %s208_s1, %s208_s1 }
  0x2d   :  { %79 = vmatpush1.bf16.msra.mxu0 %v162_v4 }
  0x2e   :  { %p215_p5 = por %p214_p4, %p213_p3 }
  0x30   :  { %146 = vmatmul.mubr.msk.bf16.vlgmr.msra.gmra.mrb[0].mxu0 %vm72_vm0, %v163_v5  ;;  %p216_p6 = pnand %p215_p5, %p209_p2 }
 0x103   :  { %v110_v6 = vpop.f32.mrb[0].mxu0 }
 0x104   :  { %119 = vst [vmem:[#allocation7] sm:$0xff] %v110_v6  ;;  %v112_v7 = vpop.f32.mrb[1].mxu0 }
 0x105   :  { %120 = vst [vmem:[#allocation7 + $0x8] sm:$0xff] %v112_v7  ;;  %v114_v8 = vpop.f32.mrb[2].mxu0 }
 0x106   :  { %121 = vst [vmem:[#allocation7 + $0x10] sm:$0xff] %v114_v8  ;;  %v116_v9 = vpop.f32.mrb[3].mxu0 }
 0x107   :  { %122 = vst [vmem:[#allocation7 + $0x18] sm:$0xff] %v116_v9 }
 0x108   :  { %219 = shalt.err (!%p216_p6)
}
 0x109   :  { %s220_s12 = scalar_lea.hbm %s299_s2, 512 }
 0x10a   :  { %p221_p7 = scmp.ne.s32.totalorder %s299_s2, %s220_s12  ;;  %p224_p8 = scmp.lt.u32.totalorder %s220_s12, %s299_s2 }
 0x10c   :  { %p226_p9 = pnand %p224_p8, %p221_p7 }
 0x10e   :  { %229 = shalt.err (!%p226_p9)
}
 0x10f   :  { %s244_s17 = smov 256   ;;  %s245_s18 = smov 16  }
 0x110   :  { %134 = dma.vmem_to_hbm [thread:$0]  %s129_s9, 512, %s299_s2, [#allocation4], %s244_s17, %s244_s17, %s245_s18  }
 0x111   :  { %234 = dma.done.wait [#allocation4], 512  }
 0x112   :  { %235 = vsyncadd [#allocation4], 4294966784 }
 0x113   :  { %138 = vsyncpa [#allocation3], 1 }
 0x114   :  { %139 = vsyncpa [#allocation6], 1 }
 0x115   :  { %140 = vsyncpa [#allocation4], 1 }

</bundles_post_ra>
